<compile_context>
chip_gen: v7x
topology: tpu7x:2x2x1
jax: 0.10.0
libtpu: 0.0.40
codegen_flags: <defaults>
</compile_context>

<pallas_src>
import jax
import jax.numpy as jnp
from jax import lax
from jax.experimental import pallas as pl
from jax.experimental.pallas import tpu as pltpu


def _round_up(x, m):
    return ((x + m - 1) // m) * m


def _bayias_ce_kernel(logits_ref, target_ref, adjust_ref, weight_ref,
                      wloss_ref, wsum_ref):
    x = logits_ref[...].astype(jnp.float32)            # (tm, C)
    adj = adjust_ref[...].astype(jnp.float32)          # (1, C)
    w = weight_ref[...].astype(jnp.float32)            # (1, C)
    t = target_ref[...]                                # (tm, 1) int32

    z = x + adj                                        # logit adjustment
    m = jnp.max(z, axis=1, keepdims=True)              # (tm, 1) row max (stable)
    lse = m + jnp.log(jnp.sum(jnp.exp(z - m), axis=1, keepdims=True))  # (tm, 1)

    tm, C = z.shape
    lane = lax.broadcasted_iota(jnp.int32, (tm, C), 1)
    sel = (lane == t).astype(jnp.float32)              # on-the-fly one-hot

    z_t = jnp.sum(sel * z, axis=1, keepdims=True)      # target logit   (tm, 1)
    w_t = jnp.sum(sel * w, axis=1, keepdims=True)      # class weight   (tm, 1)
    nll = lse - z_t                                    # -log softmax[target]

    wloss_ref[...] = (w_t * nll).astype(jnp.float32)
    wsum_ref[...] = w_t.astype(jnp.float32)


def bayias_loss(logits, target, cls_num_list=None, per_cls_weights=None,
                block_rows=256):
    """logits: (N, C) float, target: (N,) int. Returns scalar float32 loss."""
    N, C = logits.shape

    if cls_num_list is None:
        # Original module: plain (unweighted) cross entropy, no adjustment.
        adjust = jnp.zeros((1, C), jnp.float32)
        weight = jnp.ones((1, C), jnp.float32)
    else:
        m = jnp.asarray(cls_num_list, jnp.float32)
        m = m / jnp.sum(m)
        adjust = (jnp.log(m + 1e-12) + jnp.log(float(C))).reshape(1, C)
        # TODO(synk): self.per_cls_weights is referenced but never defined in
        # the original PyTorch module; we take it as an explicit optional
        # argument (uniform weights when omitted).
        if per_cls_weights is None:
            weight = jnp.ones((1, C), jnp.float32)
        else:
            weight = jnp.asarray(per_cls_weights, jnp.float32).reshape(1, C)

    tm = min(block_rows, _round_up(N, 8))
    n_pad = _round_up(N, tm)
    if n_pad != N:
        logits = jnp.pad(logits, ((0, n_pad - N), (0, 0)))
        target = jnp.pad(target, ((0, n_pad - N),))
    target2d = target.astype(jnp.int32).reshape(n_pad, 1)

    bytes_per_step = (
        tm * C * jnp.dtype(logits.dtype).itemsize      # logits tile
        + tm * 4                                       # target tile
        + 2 * C * 4                                    # adjust + weight
        + 2 * tm * 4                                   # per-row outputs
    )
    vmem_limit = int(min(max(4 * bytes_per_step + (1 << 20), 16 << 20), 64 << 20))

    wloss, wsum = pl.pallas_call(
        _bayias_ce_kernel,
        out_shape=(
            jax.ShapeDtypeStruct((n_pad, 1), jnp.float32),
            jax.ShapeDtypeStruct((n_pad, 1), jnp.float32),
        ),
        grid_spec=pltpu.PrefetchScalarGridSpec(
            num_scalar_prefetch=0,
            grid=(n_pad // tm,),
            in_specs=[
                pl.BlockSpec((tm, C), lambda i: (i, 0)),   # logits row block
                pl.BlockSpec((tm, 1), lambda i: (i, 0)),   # targets row block
                pl.BlockSpec((1, C), lambda i: (0, 0)),    # adjust term
                pl.BlockSpec((1, C), lambda i: (0, 0)),    # per-class weights
            ],
            out_specs=(
                pl.BlockSpec((tm, 1), lambda i: (i, 0)),
                pl.BlockSpec((tm, 1), lambda i: (i, 0)),
            ),
        ),
        compiler_params=pltpu.CompilerParams(
            dimension_semantics=("parallel",),
            vmem_limit_bytes=vmem_limit,
        ),
    )(logits, target2d, adjust, weight)

    # Weighted-mean reduction (PyTorch F.cross_entropy semantics); padded rows
    # are discarded. Tiny O(N) finalization left to XLA.
    return jnp.sum(wloss[:N, 0]) / jnp.sum(wsum[:N, 0])


def _reference(logits, target, cls_num_list=None, per_cls_weights=None):
    # Pure-JAX reference matching the PyTorch module.
    N, C = logits.shape
    x = logits.astype(jnp.float32)
    if cls_num_list is None:
        z = x
        w = jnp.ones((C,), jnp.float32)
    else:
        m = jnp.asarray(cls_num_list, jnp.float32)
        m = m / jnp.sum(m)
        z = x + (jnp.log(m + 1e-12) + jnp.log(float(C)))[None, :]
        w = (jnp.ones((C,), jnp.float32) if per_cls_weights is None
             else jnp.asarray(per_cls_weights, jnp.float32))
    logp = jax.nn.log_softmax(z, axis=1)
    nll = -jnp.take_along_axis(logp, target[:, None].astype(jnp.int32), axis=1)[:, 0]
    wt = w[target]
    return jnp.sum(wt * nll) / jnp.sum(wt)


if __name__ == "__main__":
    key = jax.random.PRNGKey(0)
    k_x, k_t = jax.random.split(key)

    N, C = 64, 10
    logits = jax.random.normal(k_x, (N, C), dtype=jnp.float32)
    target = jax.random.randint(k_t, (N,), 0, C, dtype=jnp.int32)

    # Long-tailed class-frequency prior + inverse-frequency per-class weights.
    cls_num_list = [500.0, 300.0, 200.0, 120.0, 80.0, 50.0, 30.0, 20.0, 12.0, 8.0]
    inv = [1.0 / c for c in cls_num_list]
    per_cls_weights = [C * v / sum(inv) for v in inv]

    # Branch with class prior (logit adjustment) + per-class weights.
    loss = bayias_loss(logits, target, cls_num_list, per_cls_weights)
    jax.block_until_ready(loss)
    ref = _reference(logits, target, cls_num_list, per_cls_weights)
    assert jnp.allclose(loss, ref, rtol=1e-4, atol=1e-5), (loss, ref)

    # Branch without class prior: plain unweighted cross entropy.
    loss0 = bayias_loss(logits, target, None)
    jax.block_until_ready(loss0)
    ref0 = _reference(logits, target, None)
    assert jnp.allclose(loss0, ref0, rtol=1e-4, atol=1e-5), (loss0, ref0)

    print("KERNEL_OK")
</pallas_src>

<mosaic_0001>
module attributes {stable_mosaic.version = 11 : i64} {
  func.func @_bayias_ce_kernel(%arg0: i32, %arg1: memref<64x10xf32, #tpu.memory_space<vmem>>, %arg2: memref<64x1xi32, #tpu.memory_space<vmem>>, %arg3: memref<1x10xf32, #tpu.memory_space<vmem>>, %arg4: memref<1x10xf32, #tpu.memory_space<vmem>>, %arg5: memref<64x1xf32, #tpu.memory_space<vmem>>, %arg6: memref<64x1xf32, #tpu.memory_space<vmem>>) attributes {dimension_semantics = [#tpu.dimension_semantics<parallel>], iteration_bounds = array<i64: 1>, scalar_prefetch = 0 : i64, scratch_operands = 0 : i64, tpu.core_type = #tpu.core_type<tc>, window_params = [{transform_indices = @transform_0, window_bounds = array<i64: 64, 10>}, {transform_indices = @transform_1, window_bounds = array<i64: 64, 1>}, {pipeline_mode = #tpu.pipeline_mode<synchronous>, transform_indices = @transform_2, window_bounds = array<i64: 1, 10>}, {pipeline_mode = #tpu.pipeline_mode<synchronous>, transform_indices = @transform_3, window_bounds = array<i64: 1, 10>}, {transform_indices = @transform_4, window_bounds = array<i64: 64, 1>}, {transform_indices = @transform_5, window_bounds = array<i64: 64, 1>}]} {
    %c0 = arith.constant 0 : index
    %c0_0 = arith.constant 0 : index
    %0 = vector.load %arg1[%c0, %c0_0] : memref<64x10xf32, #tpu.memory_space<vmem>>, vector<64x10xf32>
    %c0_1 = arith.constant 0 : index
    %c0_2 = arith.constant 0 : index
    %1 = vector.load %arg3[%c0_1, %c0_2] : memref<1x10xf32, #tpu.memory_space<vmem>>, vector<1x10xf32>
    %c0_3 = arith.constant 0 : index
    %c0_4 = arith.constant 0 : index
    %2 = vector.load %arg4[%c0_3, %c0_4] : memref<1x10xf32, #tpu.memory_space<vmem>>, vector<1x10xf32>
    %c0_5 = arith.constant 0 : index
    %c0_6 = arith.constant 0 : index
    %3 = vector.load %arg2[%c0_5, %c0_6] : memref<64x1xi32, #tpu.memory_space<vmem>>, vector<64x1xi32>
    %4 = vector.broadcast %1 : vector<1x10xf32> to vector<64x10xf32>
    %5 = arith.addf %0, %4 : vector<64x10xf32>
    %cst = arith.constant dense<0xFF800000> : vector<64xf32>
    %6 = vector.multi_reduction <maximumf>, %5, %cst [1] : vector<64x10xf32> to vector<64xf32>
    %7 = vector.shape_cast %6 : vector<64xf32> to vector<64x1xf32>
    %8 = vector.broadcast %7 : vector<64x1xf32> to vector<64x10xf32>
    %9 = arith.subf %5, %8 : vector<64x10xf32>
    %10 = math.exp %9 : vector<64x10xf32>
    %cst_7 = arith.constant dense<0.000000e+00> : vector<64xf32>
    %11 = vector.multi_reduction <add>, %10, %cst_7 [1] : vector<64x10xf32> to vector<64xf32>
    %12 = vector.shape_cast %11 : vector<64xf32> to vector<64x1xf32>
    %13 = math.log %12 : vector<64x1xf32>
    %14 = arith.addf %7, %13 : vector<64x1xf32>
    %15 = tpu.iota {dimensions = array<i32: 1>} : vector<64x10xi32>
    %16 = vector.broadcast %3 : vector<64x1xi32> to vector<64x10xi32>
    %17 = arith.cmpi eq, %15, %16 : vector<64x10xi32>
    %18 = arith.extui %17 : vector<64x10xi1> to vector<64x10xi32>
    %19 = arith.sitofp %18 : vector<64x10xi32> to vector<64x10xf32>
    %20 = arith.mulf %19, %5 : vector<64x10xf32>
    %cst_8 = arith.constant dense<0.000000e+00> : vector<64xf32>
    %21 = vector.multi_reduction <add>, %20, %cst_8 [1] : vector<64x10xf32> to vector<64xf32>
    %22 = vector.shape_cast %21 : vector<64xf32> to vector<64x1xf32>
    %23 = vector.broadcast %2 : vector<1x10xf32> to vector<64x10xf32>
    %24 = arith.mulf %19, %23 : vector<64x10xf32>
    %cst_9 = arith.constant dense<0.000000e+00> : vector<64xf32>
    %25 = vector.multi_reduction <add>, %24, %cst_9 [1] : vector<64x10xf32> to vector<64xf32>
    %26 = vector.shape_cast %25 : vector<64xf32> to vector<64x1xf32>
    %27 = arith.subf %14, %22 : vector<64x1xf32>
    %28 = arith.mulf %26, %27 : vector<64x1xf32>
    %c0_10 = arith.constant 0 : index
    %c0_11 = arith.constant 0 : index
    %29 = vector.load %arg5[%c0_10, %c0_11] : memref<64x1xf32, #tpu.memory_space<vmem>>, vector<64x1xf32>
    tpu.vector_store %arg5[%c0_10, %c0_11], %28 {strides = array<i32>} : memref<64x1xf32, #tpu.memory_space<vmem>>, vector<64x1xf32>,
    %c0_12 = arith.constant 0 : index
    %c0_13 = arith.constant 0 : index
    %30 = vector.load %arg6[%c0_12, %c0_13] : memref<64x1xf32, #tpu.memory_space<vmem>>, vector<64x1xf32>
    tpu.vector_store %arg6[%c0_12, %c0_13], %26 {strides = array<i32>} : memref<64x1xf32, #tpu.memory_space<vmem>>, vector<64x1xf32>,
    return
  }
  func.func @transform_0(%arg0: i32) -> (i32, i32) {
    %c0_i32 = arith.constant 0 : i32
    %c0_i32_0 = arith.constant 0 : i32
    return %arg0, %c0_i32 : i32, i32
  }
  func.func @transform_1(%arg0: i32) -> (i32, i32) {
    %c0_i32 = arith.constant 0 : i32
    %c0_i32_0 = arith.constant 0 : i32
    return %arg0, %c0_i32 : i32, i32
  }
  func.func @transform_2(%arg0: i32) -> (i32, i32) {
    %c0_i32 = arith.constant 0 : i32
    %c0_i32_0 = arith.constant 0 : i32
    %c0_i32_1 = arith.constant 0 : i32
    return %c0_i32, %c0_i32_0 : i32, i32
  }
  func.func @transform_3(%arg0: i32) -> (i32, i32) {
    %c0_i32 = arith.constant 0 : i32
    %c0_i32_0 = arith.constant 0 : i32
    %c0_i32_1 = arith.constant 0 : i32
    return %c0_i32, %c0_i32_0 : i32, i32
  }
  func.func @transform_4(%arg0: i32) -> (i32, i32) {
    %c0_i32 = arith.constant 0 : i32
    %c0_i32_0 = arith.constant 0 : i32
    return %arg0, %c0_i32 : i32, i32
  }
  func.func @transform_5(%arg0: i32) -> (i32, i32) {
    %c0_i32 = arith.constant 0 : i32
    %c0_i32_0 = arith.constant 0 : i32
    return %arg0, %c0_i32 : i32, i32
  }
}

</mosaic_0001>

<bundles_post_ra>
// kernel: tpu_custom_call.1
= control target key start
LH: loop header
LB: loop body
LE: loop exit
PB: predicated region body
PF: predicated region fallthrough
CT: control target
= control target key end

     0   :  { %vm51_vm0 = vcmask 80896   ;;  %v355_v3 = vmov 0   ;;  %v148_v40 = vlaneseq  ;;  %v356_v46 = vmov 0.0   ;;  %s651_s0 = inlined_call_operand.vmem [shape: f32[64,10], index: 0, kind: input, shape index: {}]   ;;  %s652_s2 = inlined_call_operand.vmem [shape: f32[1,10], index: 2, kind: input, shape index: {}]   ;;  %s653_s1 = inlined_call_operand.vmem [shape: s32[64,1], index: 1, kind: input, shape index: {}]   ;;  %s654_s3 = inlined_call_operand.vmem [shape: f32[1,10], index: 3, kind: input, shape index: {}]   ;;  %s655_s5 = inlined_call_operand.vmem [shape: f32[64,1], index: 5, kind: output, shape index: {1}]   ;;  %s656_s4 = inlined_call_operand.vmem [shape: f32[64,1], index: 4, kind: output, shape index: {0}]  }
   0x1   :  { %v21_v0 = vld [vmem:[%s651_s0 + $0x10] sm:$0xff]  ;;  %v309_v1 = vld [vmem:[%s652_s2] ss:$0 sm:$0xff]  ;;  %322 = vset.pattern.permute.xlu1 %v355_v3  ;;  %321 = vset.pattern.permute.xlu0 %v355_v3  ;;  %v22_v6 = vld [vmem:[%s651_s0 + $0x18] sm:$0xff]  ;;  %vm284_vm9 = vcmask 7168  }
   0x2   :  { %v19_v2 = vld [vmem:[%s651_s0] sm:$0xff]  ;;  %v396_v4 = vadd.f32 %v309_v1, %v21_v0  ;;  %v20_v7 = vld [vmem:[%s651_s0 + $0x8] sm:$0xff]  ;;  %v406_v8 = vadd.f32 %v309_v1, %v22_v6  ;;  %v26_v18 = vld [vmem:[%s651_s0 + $0x38] sm:$0xff]  ;;  %v481_v42 = vand.u32 127, %v148_v40 }
   0x3   :  { %v398_v5 = vadd.f32 %v309_v1, %v19_v2  ;;  %v44_v9 = vadd.f32 %v309_v1, %v20_v7  ;;  %v24_v10 = vld [vmem:[%s651_s0 + $0x28] sm:$0xff]  ;;  %v23_v11 = vld [vmem:[%s651_s0 + $0x20] sm:$0xff]  ;;  %v25_v19 = vld [vmem:[%s651_s0 + $0x30] sm:$0xff]  ;;  %v435_v22 = vadd.f32 %v309_v1, %v26_v18 }
   0x4   :  { %v58_v12 = vsel %vm51_vm0, %v396_v4, -inf  ;;  %v61_v14 = vsel %vm51_vm0, %v406_v8, -inf  ;;  %v421_v16 = vadd.f32 %v309_v1, %v24_v10  ;;  %v423_v17 = vadd.f32 %v309_v1, %v23_v11  ;;  %v30_v26 = vld [vmem:[%s653_s1 + $0x8] sm:$0xff]  ;;  %v31_v27 = vld [vmem:[%s653_s1 + $0x10] sm:$0xff]  ;;  %v29_v28 = vld [vmem:[%s653_s1] sm:$0xff] }
   0x5   :  { %v52_v13 = vsel %vm51_vm0, %v398_v5, -inf  ;;  %59 = vmax.xlane.f32.xlu1 %v58_v12  ;;  %v55_v15 = vsel %vm51_vm0, %v44_v9, -inf  ;;  %v437_v23 = vadd.f32 %v309_v1, %v25_v19  ;;  %v73_v24 = vsel %vm51_vm0, %v435_v22, -inf  ;;  %v32_v29 = vld [vmem:[%s653_s1 + $0x18] sm:$0xff]  ;;  %v33_v30 = vld [vmem:[%s653_s1 + $0x20] sm:$0xff]  ;;  %v34_v31 = vld [vmem:[%s653_s1 + $0x28] sm:$0xff] }
   0x6   :  { %53 = vmax.xlane.f32.xlu0 %v52_v13  ;;  %v67_v20 = vsel %vm51_vm0, %v421_v16, -inf  ;;  %v64_v21 = vsel %vm51_vm0, %v423_v17, -inf  ;;  %v35_v32 = vld [vmem:[%s653_s1 + $0x30] sm:$0xff]  ;;  %v36_v33 = vld [vmem:[%s653_s1 + $0x38] sm:$0xff] }
   0x7   :  { %v70_v25 = vsel %vm51_vm0, %v437_v23, -inf }
   0x9   :  { %62 = vmax.xlane.f32.xlu1 %v61_v14 }
   0xa   :  { %56 = vmax.xlane.f32.xlu0 %v55_v15 }
   0xd   :  { %68 = vmax.xlane.f32.xlu1 %v67_v20 }
   0xe   :  { %65 = vmax.xlane.f32.xlu0 %v64_v21 }
  0x11   :  { %74 = vmax.xlane.f32.xlu1 %v73_v24 }
  0x12   :  { %71 = vmax.xlane.f32.xlu0 %v70_v25 }
  0x22   :  { %154 = vperm.xlu1 %322, %v30_v26  }
  0x26   :  { %157 = vperm.xlu1 %322, %v31_v27  }
  0x28   :  { %151 = vperm.xlu0 %321, %v29_v28  }
  0x2a   :  { %160 = vperm.xlu1 %322, %v32_v29  }
  0x2e   :  { %163 = vperm.xlu1 %322, %v33_v30  }
  0x32   :  { %166 = vperm.xlu1 %322, %v34_v31  }
  0x36   :  { %169 = vperm.xlu1 %322, %v35_v32  }
  0x3a   :  { %172 = vperm.xlu1 %322, %v36_v33  }
  0x92   :  { %v467_v34 = vpop.xlane.xlu1 %59 }
  0x93   :  { %v469_v35 = vpop.xlane.xlu0 %53  ;;  %v78_v48 = vsub.f32 %v396_v4, %v467_v34 }
  0x94   :  { %v76_v50 = vsub.f32 %v398_v5, %v469_v35 }
  0x95   :  { %v88_v57 = vmul.f32 1.442695, %v78_v48 }
  0x96   :  { %v471_v36 = vpop.xlane.xlu1 %62  ;;  %v84_v60 = vmul.f32 1.442695, %v76_v50 }
  0x97   :  { %v473_v37 = vpop.xlane.xlu0 %56  ;;  %v79_v58 = vsub.f32 %v406_v8, %v471_v36 }
  0x98   :  { %v77_v44 = vsub.f32 %v44_v9, %v473_v37 }
  0x99   :  { %v90_v2 = vmul.f32 1.442695, %v79_v58 }
  0x9a   :  { %v475_v38 = vpop.xlane.xlu1 %68  ;;  %v86_v51 = vmul.f32 1.442695, %v77_v44 }
  0x9b   :  { %v477_v39 = vpop.xlane.xlu0 %65  ;;  %v81_v3 = vsub.f32 %v421_v16, %v475_v38 }
  0x9c   :  { %323 = vpow2.f32 %v86_v51  ;;  %v80_v61 = vsub.f32 %v423_v17, %v477_v39 }
  0x9d   :  { %325 = vpow2.f32 %v88_v57  ;;  %v94_v12 = vmul.f32 1.442695, %v81_v3 }
  0x9e   :  { %v479_v41 = vpop.xlane.xlu1 %74  ;;  %327 = vpow2.f32 %v84_v60  ;;  %v92_v6 = vmul.f32 1.442695, %v80_v61 }
  0x9f   :  { %v483_v43 = vpop.xlane.xlu0 %71  ;;  %329 = vpow2.f32 %v90_v2  ;;  %v83_v13 = vsub.f32 %v435_v22, %v479_v41 }
  0xa0   :  { %v82_v7 = vsub.f32 %v437_v23, %v483_v43  ;;  %331 = vpow2.f32 %v92_v6 }
  0xa1   :  { %333 = vpow2.f32 %v94_v12  ;;  %v98_v24 = vmul.f32 1.442695, %v83_v13 }
  0xa2   :  { %v155_v45 = vpop.permute.xlu1 %154  ;;  %v96_v14 = vmul.f32 1.442695, %v82_v7 }
  0xa3   :  { %vm175_vm1 = vcmp.eq.s32.totalorder %v481_v42, %v155_v45 }
  0xa4   :  { %v488_v47 = vsel %vm175_vm1, 1.0, %v356_v46  ;;  %335 = vpow2.f32 %v96_v14 }
  0xa5   :  { %v199_v49 = vmul.f32 %v488_v47, %v44_v9  ;;  %337 = vpow2.f32 %v98_v24 }
  0xa6   :  { %v158_v52 = vpop.permute.xlu1 %157  ;;  %v324_v19 = vpop.eup %323 }
  0xa7   :  { %v152_v53 = vpop.permute.xlu0 %151  ;;  %vm176_vm2 = vcmp.eq.s32.totalorder %v481_v42, %v158_v52  ;;  %v209_v54 = vsel %vm51_vm0, %v199_v49, 0.0  ;;  %v103_v26 = vsel %vm51_vm0, %v324_v19, 0.0 }
  0xa8   :  { %vm174_vm3 = vcmp.eq.s32.totalorder %v481_v42, %v152_v53  ;;  %v499_v55 = vsel %vm176_vm2, 1.0, %v356_v46  ;;  %210 = vadd.xlane.f32.xlu1 %v209_v54  ;;  %v318_v54 = vld [vmem:[%s654_s3] ss:$0 sm:$0xff] }
  0xa9   :  { %v502_v56 = vsel %vm174_vm3, 1.0, %v356_v46  ;;  %v200_v0 = vmul.f32 %v499_v55, %v396_v4  ;;  %v237_v60 = vmul.f32 %v318_v54, %v488_v47  ;;  %v238_v61 = vmul.f32 %v318_v54, %v499_v55 }
  0xaa   :  { %v198_v59 = vmul.f32 %v502_v56, %v398_v5  ;;  %v161_v62 = vpop.permute.xlu1 %160 }
  0xab   :  { %vm177_vm4 = vcmp.eq.s32.totalorder %v481_v42, %v161_v62  ;;  %v212_v10 = vsel %vm51_vm0, %v200_v0, 0.0  ;;  %v247_v62 = vsel %vm51_vm0, %v237_v60, 0.0 }
  0xac   :  { %v206_v63 = vsel %vm51_vm0, %v198_v59, 0.0  ;;  %v515_v1 = vsel %vm177_vm4, 1.0, %v356_v46  ;;  %v236_v59 = vmul.f32 %v318_v54, %v502_v56 }
  0xad   :  { %207 = vadd.xlane.f32.xlu0 %v206_v63  ;;  %v201_v5 = vmul.f32 %v515_v1, %v406_v8  ;;  %v250_v63 = vsel %vm51_vm0, %v238_v61, 0.0 }
  0xae   :  { %v164_v9 = vpop.permute.xlu1 %163 }
  0xaf   :  { %vm178_vm5 = vcmp.eq.s32.totalorder %v481_v42, %v164_v9  ;;  %v215_v4 = vsel %vm51_vm0, %v201_v5, 0.0 }
  0xb0   :  { %v527_v11 = vsel %vm178_vm5, 1.0, %v356_v46  ;;  %216 = vadd.xlane.f32.xlu1 %v215_v4 }
  0xb1   :  { %213 = vadd.xlane.f32.xlu0 %v212_v10  ;;  %v202_v8 = vmul.f32 %v527_v11, %v423_v17  ;;  %v326_v17 = vpop.eup %325  ;;  %v240_v56 = vmul.f32 %v318_v54, %v527_v11 }
  0xb2   :  { %v167_v15 = vpop.permute.xlu1 %166  ;;  %v328_v27 = vpop.eup %327  ;;  %v106_v31 = vsel %vm51_vm0, %v326_v17, 0.0 }
  0xb3   :  { %vm179_vm6 = vcmp.eq.s32.totalorder %v481_v42, %v167_v15  ;;  %v218_v18 = vsel %vm51_vm0, %v202_v8, 0.0  ;;  %v330_v29 = vpop.eup %329  ;;  %v100_v30 = vsel %vm51_vm0, %v328_v27, 0.0  ;;  %v256_v2 = vsel %vm51_vm0, %v240_v56, 0.0 }
  0xb4   :  { %v315_v20 = vsel %vm179_vm6, 1.0, %v356_v46  ;;  %v332_v32 = vpop.eup %331  ;;  %v109_v40 = vsel %vm51_vm0, %v330_v29, 0.0 }
  0xb5   :  { %219 = vadd.xlane.f32.xlu0 %v218_v18  ;;  %v203_v21 = vmul.f32 %v315_v20, %v421_v16  ;;  %v334_v33 = vpop.eup %333  ;;  %v112_v44 = vsel %vm51_vm0, %v332_v32, 0.0  ;;  %v241_v3 = vmul.f32 %v318_v54, %v315_v20 }
  0xb6   :  { %v170_v28 = vpop.permute.xlu1 %169  ;;  %v336_v45 = vpop.eup %335  ;;  %v115_v49 = vsel %vm51_vm0, %v334_v33, 0.0 }
  0xb7   :  { %v221_v25 = vsel %vm51_vm0, %v203_v21, 0.0  ;;  %vm180_vm7 = vcmp.eq.s32.totalorder %v481_v42, %v170_v28  ;;  %v118_v50 = vsel %vm51_vm0, %v336_v45, 0.0  ;;  %v338_v52 = vpop.eup %337  ;;  %v259_v55 = vsel %vm51_vm0, %v241_v3, 0.0 }
  0xb8   :  { %222 = vadd.xlane.f32.xlu1 %v221_v25  ;;  %v316_v48 = vsel %vm180_vm7, 1.0, %v356_v46  ;;  %v121_v57 = vsel %vm51_vm0, %v338_v52, 0.0 }
  0xb9   :  { %104 = vadd.xlane.f32.xlu0 %v103_v26  ;;  %v204_v51 = vmul.f32 %v316_v48, %v437_v23  ;;  %v242_v47 = vmul.f32 %v318_v54, %v316_v48 }
  0xba   :  { %v173_v16 = vpop.permute.xlu1 %172 }
  0xbb   :  { %vm181_vm8 = vcmp.eq.s32.totalorder %v481_v42, %v173_v16  ;;  %v224_v58 = vsel %vm51_vm0, %v204_v51, 0.0  ;;  %v262_v5 = vsel %vm51_vm0, %v242_v47, 0.0 }
  0xbc   :  { %101 = vadd.xlane.f32.xlu1 %v100_v30  ;;  %v317_v53 = vsel %vm181_vm8, 1.0, %v356_v46  ;;  %v244_v46 = vsel %vm51_vm0, %v236_v59, 0.0 }
  0xbd   :  { %107 = vadd.xlane.f32.xlu0 %v106_v31  ;;  %v205_v42 = vmul.f32 %v317_v53, %v435_v22  ;;  %v239_v22 = vmul.f32 %v318_v54, %v515_v1  ;;  %v243_v6 = vmul.f32 %v318_v54, %v317_v53 }
  0xbf   :  { %v227_v23 = vsel %vm51_vm0, %v205_v42, 0.0  ;;  %v253_v0 = vsel %vm51_vm0, %v239_v22, 0.0  ;;  %v265_v1 = vsel %vm51_vm0, %v243_v6, 0.0 }
  0xc0   :  { %110 = vadd.xlane.f32.xlu1 %v109_v40 }
  0xc1   :  { %113 = vadd.xlane.f32.xlu0 %v112_v44 }
  0xc4   :  { %116 = vadd.xlane.f32.xlu1 %v115_v49 }
  0xc5   :  { %119 = vadd.xlane.f32.xlu0 %v118_v50 }
  0xc8   :  { %122 = vadd.xlane.f32.xlu1 %v121_v57 }
  0xc9   :  { %225 = vadd.xlane.f32.xlu0 %v224_v58 }
  0xcc   :  { %228 = vadd.xlane.f32.xlu1 %v227_v23 }
  0xcd   :  { %245 = vadd.xlane.f32.xlu0 %v244_v46 }
  0xd0   :  { %248 = vadd.xlane.f32.xlu1 %v247_v62 }
  0xd1   :  { %251 = vadd.xlane.f32.xlu0 %v250_v63 }
  0xd4   :  { %254 = vadd.xlane.f32.xlu1 %v253_v0 }
  0xd5   :  { %257 = vadd.xlane.f32.xlu0 %v256_v2 }
  0xd8   :  { %260 = vadd.xlane.f32.xlu1 %v259_v55 }
  0xd9   :  { %263 = vadd.xlane.f32.xlu0 %v262_v5 }
  0xdc   :  { %266 = vadd.xlane.f32.xlu1 %v265_v1 }
 0x135   :  { %v211_v9 = vpop.xlane.xlu1 %210 }
 0x13a   :  { %v208_v7 = vpop.xlane.xlu0 %207 }
 0x13d   :  { %v570_v10 = vpop.xlane.xlu1 %216 }
 0x13e   :  { %v214_v4 = vpop.xlane.xlu0 %213 }
 0x142   :  { %v572_v11 = vpop.xlane.xlu0 %219 }
 0x145   :  { %v574_v12 = vpop.xlane.xlu1 %222 }
 0x146   :  { %v105_v8 = vpop.xlane.xlu0 %104 }
 0x147   :  { %339 = vlog2.f32 %v105_v8 }
 0x149   :  { %v102_v13 = vpop.xlane.xlu1 %101 }
 0x14a   :  { %v108_v14 = vpop.xlane.xlu0 %107  ;;  %341 = vlog2.f32 %v102_v13 }
 0x14b   :  { %343 = vlog2.f32 %v108_v14 }
 0x14d   :  { %v111_v15 = vpop.xlane.xlu1 %110 }
 0x14e   :  { %v114_v18 = vpop.xlane.xlu0 %113  ;;  %345 = vlog2.f32 %v111_v15 }
 0x14f   :  { %347 = vlog2.f32 %v114_v18 }
 0x151   :  { %v340_v19 = vpop.eup %339  ;;  %v117_v20 = vpop.xlane.xlu1 %116 }
 0x152   :  { %v120_v21 = vpop.xlane.xlu0 %119  ;;  %349 = vlog2.f32 %v117_v20  ;;  %v127_v17 = vmul.f32 0.6931472, %v340_v19 }
 0x153   :  { %351 = vlog2.f32 %v120_v21 }
 0x154   :  { %v342_v24 = vpop.eup %341  ;;  %v141_v32 = vadd.f32 %v127_v17, %v473_v37 }
 0x155   :  { %v344_v25 = vpop.eup %343  ;;  %v125_v26 = vmul.f32 0.6931472, %v342_v24  ;;  %v123_v27 = vpop.xlane.xlu1 %122 }
 0x156   :  { %v226_v28 = vpop.xlane.xlu0 %225  ;;  %v129_v29 = vmul.f32 0.6931472, %v344_v25  ;;  %353 = vlog2.f32 %v123_v27  ;;  %v269_v37 = vsub.f32 %v141_v32, %v211_v9 }
 0x157   :  { %v140_v30 = vadd.f32 %v125_v26, %v469_v35 }
 0x158   :  { %v346_v31 = vpop.eup %345  ;;  %v142_v16 = vadd.f32 %v129_v29, %v467_v34 }
 0x159   :  { %v348_v33 = vpop.eup %347  ;;  %v131_v40 = vmul.f32 0.6931472, %v346_v31  ;;  %v229_v44 = vpop.xlane.xlu1 %228  ;;  %v268_v45 = vsub.f32 %v140_v30, %v208_v7 }
 0x15a   :  { %v246_v48 = vpop.xlane.xlu0 %245  ;;  %v133_v49 = vmul.f32 0.6931472, %v348_v33  ;;  %v270_v53 = vsub.f32 %v142_v16, %v214_v4 }
 0x15b   :  { %293 = vst.msk [vmem:[%s655_s5] sm:$0xff] %vm284_vm9, %v246_v48  ;;  %v276_v50 = vmul.f32 %v268_v45, %v246_v48  ;;  %v143_v35 = vadd.f32 %v131_v40, %v471_v36 }
 0x15c   :  { %v350_v51 = vpop.eup %349  ;;  %v144_v52 = vadd.f32 %v133_v49, %v477_v39 }
 0x15d   :  { %v352_v34 = vpop.eup %351  ;;  %v135_v54 = vmul.f32 0.6931472, %v350_v51  ;;  %285 = vst.msk [vmem:[%s656_s4] sm:$0xff] %vm284_vm9, %v276_v50  ;;  %v249_v57 = vpop.xlane.xlu1 %248  ;;  %v271_v60 = vsub.f32 %v143_v35, %v570_v10 }
 0x15e   :  { %v252_v58 = vpop.xlane.xlu0 %251  ;;  %v137_v42 = vmul.f32 0.6931472, %v352_v34  ;;  %v277_v59 = vmul.f32 %v269_v37, %v249_v57  ;;  %294 = vst.msk [vmem:[%s655_s5 + $0x8] sm:$0xff] %vm284_vm9, %v249_v57  ;;  %v272_v61 = vsub.f32 %v144_v52, %v572_v11 }
 0x15f   :  { %v278_v36 = vmul.f32 %v270_v53, %v252_v58  ;;  %295 = vst.msk [vmem:[%s655_s5 + $0x10] sm:$0xff] %vm284_vm9, %v252_v58  ;;  %v145_v23 = vadd.f32 %v135_v54, %v475_v38 }
 0x160   :  { %v354_v39 = vpop.eup %353  ;;  %v146_v46 = vadd.f32 %v137_v42, %v483_v43  ;;  %286 = vst.msk [vmem:[%s656_s4 + $0x8] sm:$0xff] %vm284_vm9, %v277_v59 }
 0x161   :  { %287 = vst.msk [vmem:[%s656_s4 + $0x10] sm:$0xff] %vm284_vm9, %v278_v36  ;;  %v139_v62 = vmul.f32 0.6931472, %v354_v39  ;;  %v255_v63 = vpop.xlane.xlu1 %254  ;;  %v273_v2 = vsub.f32 %v145_v23, %v574_v12 }
 0x162   :  { %v258_v22 = vpop.xlane.xlu0 %257  ;;  %v279_v38 = vmul.f32 %v271_v60, %v255_v63  ;;  %296 = vst.msk [vmem:[%s655_s5 + $0x18] sm:$0xff] %vm284_vm9, %v255_v63  ;;  %v274_v56 = vsub.f32 %v146_v46, %v226_v28 }
 0x163   :  { %v280_v43 = vmul.f32 %v272_v61, %v258_v22  ;;  %297 = vst.msk [vmem:[%s655_s5 + $0x20] sm:$0xff] %vm284_vm9, %v258_v22  ;;  %v147_v0 = vadd.f32 %v139_v62, %v479_v41 }
 0x164   :  { %288 = vst.msk [vmem:[%s656_s4 + $0x18] sm:$0xff] %vm284_vm9, %v279_v38 }
 0x165   :  { %289 = vst.msk [vmem:[%s656_s4 + $0x20] sm:$0xff] %vm284_vm9, %v280_v43  ;;  %v261_v3 = vpop.xlane.xlu1 %260  ;;  %v275_v5 = vsub.f32 %v147_v0, %v229_v44 }
 0x166   :  { %v264_v47 = vpop.xlane.xlu0 %263  ;;  %v281_v55 = vmul.f32 %v273_v2, %v261_v3  ;;  %298 = vst.msk [vmem:[%s655_s5 + $0x28] sm:$0xff] %vm284_vm9, %v261_v3 }
 0x167   :  { %v282_v41 = vmul.f32 %v274_v56, %v264_v47  ;;  %299 = vst.msk [vmem:[%s655_s5 + $0x30] sm:$0xff] %vm284_vm9, %v264_v47 }
 0x168   :  { %290 = vst.msk [vmem:[%s656_s4 + $0x28] sm:$0xff] %vm284_vm9, %v281_v55 }
 0x169   :  { %291 = vst.msk [vmem:[%s656_s4 + $0x30] sm:$0xff] %vm284_vm9, %v282_v41  ;;  %v267_v6 = vpop.xlane.xlu1 %266 }
 0x16a   :  { %v283_v1 = vmul.f32 %v275_v5, %v267_v6  ;;  %300 = vst.msk [vmem:[%s655_s5 + $0x38] sm:$0xff] %vm284_vm9, %v267_v6 }
 0x16c   :  { %292 = vst.msk [vmem:[%s656_s4 + $0x38] sm:$0xff] %vm284_vm9, %v283_v1 }

</bundles_post_ra>
